<compile_context>
chip_gen: v6e
topology: v6e:2x2x1
jax: 0.10.0
libtpu: 0.0.40
codegen_flags: <defaults>
</compile_context>

<pallas_src>
from functools import partial

import jax
import jax.numpy as jnp
from jax.experimental import pallas as pl
from jax.experimental.pallas import tpu as pltpu


def _round_up(a, b):
    return (a + b - 1) // b * b


# ---------------------------------------------------------------------------
# Pallas kernel: one tile of tokens -> proj matmul (bf16->f32) + bias + LayerNorm
# ---------------------------------------------------------------------------
def _patch_embed_kernel(p_ref, w_ref, params_ref, o_ref, *, e_real):
    # p_ref      : [TM, Kp]  bf16 im2col patches tile (zero-padded M rows / K cols)
    # w_ref      : [Kp, Ep]  bf16 conv weight, zero-padded (resident across grid)
    # params_ref : [8,  Ep]  f32: row 0 = conv bias, row 1 = LN gamma, row 2 = LN beta
    # o_ref      : [TM, Ep]  (padded E columns are written as 0 and sliced off outside)
    acc = jnp.dot(p_ref[...], w_ref[...], preferred_element_type=jnp.float32)
    params = params_ref[...]
    acc = acc + params[0:1, :]                      # broadcast conv bias over rows

    # LayerNorm over the *real* embed_dim only (padded columns of acc are exactly 0,
    # so the plain sum already equals the real-column sum; variance is masked).
    inv_e = 1.0 / e_real
    col = jax.lax.broadcasted_iota(jnp.int32, acc.shape, 1)
    valid = col < e_real
    mean = jnp.sum(acc, axis=-1, keepdims=True) * inv_e
    centered = acc - mean
    masked = jnp.where(valid, centered, 0.0)
    var = jnp.sum(masked * masked, axis=-1, keepdims=True) * inv_e
    inv = jax.lax.rsqrt(var + 1e-5)                 # eps matches torch LayerNorm default
    out = centered * inv * params[1:2, :] + params[2:3, :]   # padded cols -> 0 (gamma=beta=0)
    o_ref[...] = out.astype(o_ref.dtype)


# ---------------------------------------------------------------------------
# Wrapper (im2col glue in bf16 + padding + pallas_call)
# ---------------------------------------------------------------------------
@partial(jax.jit, static_argnames=("patch_size", "stride"))
def _overlap_patch_embed_impl(x, conv_w, conv_b, ln_g, ln_b, patch_size, stride):
    B, C, H, W = x.shape
    E = conv_w.shape[0]
    kh, kw = patch_size
    ph, pw = kh // 2, kw // 2
    Ho = (H + 2 * ph - kh) // stride + 1
    Wo = (W + 2 * pw - kw) // stride + 1
    M = B * Ho * Wo
    K = C * kh * kw

    # ---- glue: im2col (pad + strided slicing), in bf16 to halve HBM traffic ----
    xb = x.astype(jnp.bfloat16)
    xp = jnp.pad(xb, ((0, 0), (0, 0), (ph, ph), (pw, pw)))
    cols = []
    for i in range(kh):
        for j in range(kw):
            cols.append(xp[:, :, i:i + stride * Ho:stride, j:j + stride * Wo:stride])
    # ordering (C outer, (kh, kw) inner) matches conv_w.reshape(E, C*kh*kw)
    patches = jnp.stack(cols, axis=2)                      # [B, C, kh*kw, Ho, Wo]
    patches = patches.reshape(B, K, Ho * Wo)
    patches = patches.transpose(0, 2, 1).reshape(M, K)     # [M, K] bf16

    # ---- pad to lane/MXU-friendly shapes ----
    K_pad = _round_up(K, 128)
    E_pad = _round_up(E, 128)
    TM = 512                                    # multiple of 128; shrinks for tiny M
    m_round = _round_up(M, 128)
    if m_round < TM:
        TM = m_round
    M_pad = _round_up(M, TM)

    patches = jnp.pad(patches, ((0, M_pad - M), (0, K_pad - K)))
    w_mat = conv_w.reshape(E, K).T.astype(jnp.bfloat16)    # [K, E]
    w_mat = jnp.pad(w_mat, ((0, K_pad - K), (0, E_pad - E)))

    # fused parameter tile: row 0 = conv bias, row 1 = LN gamma, row 2 = LN beta
    params = jnp.zeros((8, E_pad), jnp.float32)
    params = params.at[0, :E].set(conv_b.astype(jnp.float32))
    params = params.at[1, :E].set(ln_g.astype(jnp.float32))
    params = params.at[2, :E].set(ln_b.astype(jnp.float32))

    kernel = partial(_patch_embed_kernel, e_real=E)
    out = pl.pallas_call(
        kernel,
        out_shape=jax.ShapeDtypeStruct((M_pad, E_pad), x.dtype),
        grid_spec=pltpu.PrefetchScalarGridSpec(
            num_scalar_prefetch=0,
            grid=(M_pad // TM,),
            in_specs=[
                pl.BlockSpec((TM, K_pad), lambda i: (i, 0)),     # streamed patches
                pl.BlockSpec((K_pad, E_pad), lambda i: (0, 0)),  # resident weight
                pl.BlockSpec((8, E_pad), lambda i: (0, 0)),      # fused bias/gamma/beta
            ],
            out_specs=pl.BlockSpec((TM, E_pad), lambda i: (i, 0)),
        ),
        compiler_params=pltpu.CompilerParams(
            dimension_semantics=("parallel",),   # shardable across v7x's 2 TensorCores
        ),
    )(patches, w_mat, params)

    return out[:M, :E].reshape(B, Ho * Wo, E)


def overlap_patch_embed(x, conv_w, conv_b, ln_g, ln_b, *, patch_size, stride):
    """x: [B, C, H, W] (NCHW). Returns (tokens[B, Ho*Wo, E], Ho, Wo)."""
    _, _, H, W = x.shape
    kh, kw = patch_size
    ph, pw = kh // 2, kw // 2
    Ho = (H + 2 * ph - kh) // stride + 1
    Wo = (W + 2 * pw - kw) // stride + 1
    out = _overlap_patch_embed_impl(
        x, conv_w, conv_b, ln_g, ln_b, tuple(patch_size), int(stride)
    )
    return out, Ho, Wo


# ---------------------------------------------------------------------------
# Pure-JAX reference (same bf16-input / f32-accumulation precision as the kernel)
# ---------------------------------------------------------------------------
def _reference(x, conv_w, conv_b, ln_g, ln_b, *, patch_size, stride):
    kh, kw = patch_size
    y = jax.lax.conv_general_dilated(
        x.astype(jnp.bfloat16), conv_w.astype(jnp.bfloat16),
        window_strides=(stride, stride),
        padding=((kh // 2, kh // 2), (kw // 2, kw // 2)),
        dimension_numbers=("NCHW", "OIHW", "NCHW"),
        preferred_element_type=jnp.float32,
    ) + conv_b[None, :, None, None]
    B, E, Ho, Wo = y.shape
    t = y.reshape(B, E, Ho * Wo).transpose(0, 2, 1)        # [B, T, E]
    mean = t.mean(-1, keepdims=True)
    var = ((t - mean) ** 2).mean(-1, keepdims=True)
    t = (t - mean) / jnp.sqrt(var + 1e-5) * ln_g + ln_b
    return t, Ho, Wo


if __name__ == "__main__":
    # small, module-consistent shapes
    B, C, Himg, Wimg = 2, 4, 16, 16
    embed_dim = 32
    patch_size = (5, 5)
    stride = 2

    key = jax.random.PRNGKey(0)
    k_x, k_w, k_b, k_g, k_beta = jax.random.split(key, 5)

    x = jax.random.normal(k_x, (B, C, Himg, Wimg), dtype=jnp.float32)
    conv_w = jax.random.normal(k_w, (embed_dim, C, *patch_size), dtype=jnp.float32) * 0.05
    conv_b = jax.random.normal(k_b, (embed_dim,), dtype=jnp.float32) * 0.05
    ln_g = 1.0 + 0.1 * jax.random.normal(k_g, (embed_dim,), dtype=jnp.float32)
    ln_b = 0.1 * jax.random.normal(k_beta, (embed_dim,), dtype=jnp.float32)

    out, Ho, Wo = overlap_patch_embed(
        x, conv_w, conv_b, ln_g, ln_b, patch_size=patch_size, stride=stride
    )
    out = jax.block_until_ready(out)

    ref, Ho_r, Wo_r = _reference(
        x, conv_w, conv_b, ln_g, ln_b, patch_size=patch_size, stride=stride
    )
    assert (Ho, Wo) == (Ho_r, Wo_r)
    assert out.shape == (B, Ho * Wo, embed_dim)
    max_err = float(jnp.max(jnp.abs(out - ref)))
    assert jnp.allclose(out, ref, atol=2e-2, rtol=2e-2), f"max abs err {max_err}"

    print("KERNEL_OK")
</pallas_src>

<mosaic_0001>
module attributes {stable_mosaic.version = 11 : i64} {
  func.func @_patch_embed_kernel(%arg0: i32, %arg1: memref<128x128xbf16, #tpu.memory_space<vmem>>, %arg2: memref<128x128xbf16, #tpu.memory_space<vmem>>, %arg3: memref<8x128xf32, #tpu.memory_space<vmem>>, %arg4: memref<128x128xf32, #tpu.memory_space<vmem>>) attributes {dimension_semantics = [#tpu.dimension_semantics<parallel>], iteration_bounds = array<i64: 1>, scalar_prefetch = 0 : i64, scratch_operands = 0 : i64, tpu.core_type = #tpu.core_type<tc>, window_params = [{transform_indices = @transform_0, window_bounds = array<i64: 128, 128>}, {pipeline_mode = #tpu.pipeline_mode<synchronous>, transform_indices = @transform_1, window_bounds = array<i64: 128, 128>}, {pipeline_mode = #tpu.pipeline_mode<synchronous>, transform_indices = @transform_2, window_bounds = array<i64: 8, 128>}, {transform_indices = @transform_3, window_bounds = array<i64: 128, 128>}]} {
    %c0 = arith.constant 0 : index
    %c0_0 = arith.constant 0 : index
    %0 = vector.load %arg1[%c0, %c0_0] : memref<128x128xbf16, #tpu.memory_space<vmem>>, vector<128x128xbf16>
    %c0_1 = arith.constant 0 : index
    %c0_2 = arith.constant 0 : index
    %1 = vector.load %arg2[%c0_1, %c0_2] : memref<128x128xbf16, #tpu.memory_space<vmem>>, vector<128x128xbf16>
    %cst = arith.constant dense<0.000000e+00> : vector<128x128xf32>
    %2 = tpu.matmul %0, %1, %cst {dimension_numbers = #tpu.dot_dimension_numbers<[1], [0], [0], [1], [0, 0, 1, 1], [], []>} : vector<128x128xbf16>, vector<128x128xbf16>, vector<128x128xf32> -> vector<128x128xf32>
    %c0_3 = arith.constant 0 : index
    %c0_4 = arith.constant 0 : index
    %3 = vector.load %arg3[%c0_3, %c0_4] : memref<8x128xf32, #tpu.memory_space<vmem>>, vector<8x128xf32>
    %4 = vector.extract_strided_slice %3 {offsets = [0, 0], sizes = [1, 128], strides = [1, 1]} : vector<8x128xf32> to vector<1x128xf32>
    %5 = vector.broadcast %4 : vector<1x128xf32> to vector<128x128xf32>
    %6 = arith.addf %2, %5 : vector<128x128xf32>
    %7 = tpu.iota {dimensions = array<i32: 1>} : vector<128x128xi32>
    %c32_i32 = arith.constant 32 : i32
    %8 = vector.broadcast %c32_i32 : i32 to vector<128x128xi32>
    %9 = arith.cmpi slt, %7, %8 : vector<128x128xi32>
    %cst_5 = arith.constant dense<0.000000e+00> : vector<128xf32>
    %10 = vector.multi_reduction <add>, %6, %cst_5 [1] : vector<128x128xf32> to vector<128xf32>
    %11 = vector.shape_cast %10 : vector<128xf32> to vector<128x1xf32>
    %cst_6 = arith.constant 3.125000e-02 : f32
    %12 = vector.broadcast %cst_6 : f32 to vector<128x1xf32>
    %13 = arith.mulf %11, %12 : vector<128x1xf32>
    %14 = vector.broadcast %13 : vector<128x1xf32> to vector<128x128xf32>
    %15 = arith.subf %6, %14 : vector<128x128xf32>
    %cst_7 = arith.constant 0.000000e+00 : f32
    %16 = vector.broadcast %cst_7 : f32 to vector<128x128xf32>
    %17 = arith.select %9, %15, %16 : vector<128x128xi1>, vector<128x128xf32>
    %18 = arith.mulf %17, %17 : vector<128x128xf32>
    %cst_8 = arith.constant dense<0.000000e+00> : vector<128xf32>
    %19 = vector.multi_reduction <add>, %18, %cst_8 [1] : vector<128x128xf32> to vector<128xf32>
    %20 = vector.shape_cast %19 : vector<128xf32> to vector<128x1xf32>
    %cst_9 = arith.constant 3.125000e-02 : f32
    %21 = vector.broadcast %cst_9 : f32 to vector<128x1xf32>
    %22 = arith.mulf %20, %21 : vector<128x1xf32>
    %cst_10 = arith.constant 9.99999974E-6 : f32
    %23 = vector.broadcast %cst_10 : f32 to vector<128x1xf32>
    %24 = arith.addf %22, %23 : vector<128x1xf32>
    %25 = math.rsqrt %24 : vector<128x1xf32>
    %26 = vector.broadcast %25 : vector<128x1xf32> to vector<128x128xf32>
    %27 = arith.mulf %15, %26 : vector<128x128xf32>
    %28 = vector.extract_strided_slice %3 {offsets = [1, 0], sizes = [1, 128], strides = [1, 1]} : vector<8x128xf32> to vector<1x128xf32>
    %29 = vector.broadcast %28 : vector<1x128xf32> to vector<128x128xf32>
    %30 = arith.mulf %27, %29 : vector<128x128xf32>
    %31 = vector.extract_strided_slice %3 {offsets = [2, 0], sizes = [1, 128], strides = [1, 1]} : vector<8x128xf32> to vector<1x128xf32>
    %32 = vector.broadcast %31 : vector<1x128xf32> to vector<128x128xf32>
    %33 = arith.addf %30, %32 : vector<128x128xf32>
    %c0_11 = arith.constant 0 : index
    %c0_12 = arith.constant 0 : index
    %34 = vector.load %arg4[%c0_11, %c0_12] : memref<128x128xf32, #tpu.memory_space<vmem>>, vector<128x128xf32>
    tpu.vector_store %arg4[%c0_11, %c0_12], %33 {strides = array<i32>} : memref<128x128xf32, #tpu.memory_space<vmem>>, vector<128x128xf32>,
    return
  }
  func.func @transform_0(%arg0: i32) -> (i32, i32) {
    %c0_i32 = arith.constant 0 : i32
    %c0_i32_0 = arith.constant 0 : i32
    return %arg0, %c0_i32 : i32, i32
  }
  func.func @transform_1(%arg0: i32) -> (i32, i32) {
    %c0_i32 = arith.constant 0 : i32
    %c0_i32_0 = arith.constant 0 : i32
    %c0_i32_1 = arith.constant 0 : i32
    return %c0_i32, %c0_i32_0 : i32, i32
  }
  func.func @transform_2(%arg0: i32) -> (i32, i32) {
    %c0_i32 = arith.constant 0 : i32
    %c0_i32_0 = arith.constant 0 : i32
    %c0_i32_1 = arith.constant 0 : i32
    return %c0_i32, %c0_i32_0 : i32, i32
  }
  func.func @transform_3(%arg0: i32) -> (i32, i32) {
    %c0_i32 = arith.constant 0 : i32
    %c0_i32_0 = arith.constant 0 : i32
    return %arg0, %c0_i32 : i32, i32
  }
}

</mosaic_0001>

<bundles_post_ra>
// kernel: _overlap_patch_embed_impl.1
= control target key start
LH: loop header
LB: loop body
LE: loop exit
PB: predicated region body
PF: predicated region fallthrough
CT: control target
= control target key end

     0   :  { %v48_v16 = vlaneseq  ;;  %s928_s1 = inlined_call_operand.vmem [shape: bf16[128,128], index: 1, kind: input, shape index: {}]   ;;  %s929_s0 = inlined_call_operand.vmem [shape: bf16[128,128], index: 0, kind: input, shape index: {}]   ;;  %s930_s2 = inlined_call_operand.vmem [shape: f32[8,128], index: 2, kind: input, shape index: {}]   ;;  %s931_s3 = inlined_call_operand.vmem [shape: f32[128,128], index: 3, kind: output, shape index: {}]  }
   0x1   :  { %v580_v0 = vld [vmem:[%s928_s1 + $0x38] sm:$0xff]   ;;  %v581_v1 = vld [vmem:[%s928_s1 + $0x30] sm:$0xff]   ;;  %v582_v2 = vld [vmem:[%s928_s1 + $0x28] sm:$0xff]  }
   0x2   :  { %532 = vmatprep.subr.bf16.mxu0 %v580_v0  ;;  %564 = vmatprep.subr.bf16.mxu1 %v580_v0  ;;  %v583_v3 = vld [vmem:[%s928_s1 + $0x20] sm:$0xff]   ;;  %v584_v6 = vld [vmem:[%s928_s1 + $0x18] sm:$0xff]   ;;  %v585_v7 = vld [vmem:[%s928_s1 + $0x10] sm:$0xff]   ;;  %v696_v17 = vshrl.u32 %v48_v16, 7  ;;  %v732_v53 = vand.u32 127, %v48_v16 }
   0x3   :  { %533 = vmatpush3.bf16.msra.mxu0 %v580_v0  ;;  %572 = vmatpush3.bf16.msra.mxu1 %v580_v0  ;;  %v588_v4 = vld [vmem:[%s929_s0] sm:$0xff]   ;;  %v586_v8 = vld [vmem:[%s928_s1 + $0x8] sm:$0xff]   ;;  %v592_v12 = vld [vmem:[%s929_s0 + $0x10] sm:$0xff]  }
   0x4   :  { %534 = vmatprep.subr.bf16.mxu0 %v581_v1  ;;  %565 = vmatprep.subr.bf16.mxu1 %v581_v1  ;;  %v589_v5 = vld [vmem:[%s929_s0 + $0x20] sm:$0xff]   ;;  %v590_v10 = vld [vmem:[%s929_s0 + $0x8] sm:$0xff]   ;;  %v594_v13 = vld [vmem:[%s929_s0 + $0x30] sm:$0xff]   ;;  %v50_v18 = vsub.s32 0, %v696_v17  ;;  %vm247_vm0 = vcmp.lt.s32.totalorder %v732_v53, 32 }
   0x5   :  { %548 = vmatprep.mubr.bf16.mxu0 %v588_v4  ;;  %556 = vmatprep.mubr.bf16.mxu1 %v589_v5  ;;  %v587_v9 = vld [vmem:[%s928_s1] sm:$0xff]   ;;  %v591_v11 = vld [vmem:[%s929_s0 + $0x28] sm:$0xff]   ;;  %v593_v14 = vld [vmem:[%s929_s0 + $0x18] sm:$0xff]  }
   0x6   :  { %v595_v15 = vld [vmem:[%s929_s0 + $0x38] sm:$0xff]   ;;  %v702_v19 = vld [vmem:[%s930_s2] sm:$0xff] }
   0x7   :  { %535 = vmatpush3.bf16.msra.mxu0 %v581_v1  ;;  %573 = vmatpush3.bf16.msra.mxu1 %v581_v1  ;;  %v51_v20 = vrot.slane %v702_v19, %v50_v18 }
   0x8   :  { %536 = vmatprep.subr.bf16.mxu0 %v582_v2  ;;  %566 = vmatprep.subr.bf16.mxu1 %v582_v2 }
   0xb   :  { %537 = vmatpush3.bf16.msra.mxu0 %v582_v2  ;;  %574 = vmatpush3.bf16.msra.mxu1 %v582_v2 }
   0xc   :  { %538 = vmatprep.subr.bf16.mxu0 %v583_v3  ;;  %567 = vmatprep.subr.bf16.mxu1 %v583_v3 }
   0xf   :  { %539 = vmatpush3.bf16.msra.mxu0 %v583_v3  ;;  %575 = vmatpush3.bf16.msra.mxu1 %v583_v3 }
  0x10   :  { %540 = vmatprep.subr.bf16.mxu0 %v584_v6  ;;  %568 = vmatprep.subr.bf16.mxu1 %v584_v6 }
  0x13   :  { %541 = vmatpush3.bf16.msra.mxu0 %v584_v6  ;;  %576 = vmatpush3.bf16.msra.mxu1 %v584_v6 }
  0x14   :  { %542 = vmatprep.subr.bf16.mxu0 %v585_v7  ;;  %569 = vmatprep.subr.bf16.mxu1 %v585_v7 }
  0x17   :  { %543 = vmatpush3.bf16.msra.mxu0 %v585_v7  ;;  %577 = vmatpush3.bf16.msra.mxu1 %v585_v7 }
  0x18   :  { %544 = vmatprep.subr.bf16.mxu0 %v586_v8  ;;  %570 = vmatprep.subr.bf16.mxu1 %v586_v8 }
  0x1b   :  { %545 = vmatpush3.bf16.msra.mxu0 %v586_v8  ;;  %578 = vmatpush3.bf16.msra.mxu1 %v586_v8 }
  0x1c   :  { %546 = vmatprep.subr.bf16.mxu0 %v587_v9  ;;  %571 = vmatprep.subr.bf16.mxu1 %v587_v9 }
  0x1f   :  { %547 = vmatpush3.bf16.msra.mxu0 %v587_v9  ;;  %579 = vmatpush3.bf16.msra.mxu1 %v587_v9 }
  0x22   :  { %549 = vmatmul.mubr.bf16.vlgmr.msra.gmra.mxu0 %v590_v10  ;;  %557 = vmatmul.mubr.bf16.vlgmr.msra.gmra.mxu1 %v591_v11 }
  0x23   :  { %552 = vmatprep.mubr.bf16.mxu0 %v592_v12  ;;  %560 = vmatprep.mubr.bf16.mxu1 %v594_v13 }
  0x2a   :  { %553 = vmatmul.mubr.bf16.gmra.mxu0 %v593_v14  ;;  %561 = vmatmul.mubr.bf16.gmra.mxu1 %v595_v15 }
  0xe2   :  { %v550_v21 = vpop.f32.mrf.mxu0  ;;  %v558_v22 = vpop.f32.mrf.mxu1 }
  0xe3   :  { %v191_v23 = vadd.f32 %v550_v21, %v51_v20  ;;  %v223_v24 = vadd.f32 %v558_v22, %v51_v20 }
  0xe4   :  { %v182_v25 = vpop.f32.mrf.mxu0  ;;  %v214_v26 = vpop.f32.mrf.mxu1 }
  0xe5   :  { %268 = vadd.xlane.f32.xlu0 %v223_v24  ;;  %252 = vadd.xlane.f32.xlu1 %v191_v23  ;;  %v183_v29 = vadd.f32 %v182_v25, %v51_v20  ;;  %v215_v34 = vadd.f32 %v214_v26, %v51_v20 }
  0xe6   :  { %v551_v27 = vpop.f32.mrf.mxu0  ;;  %v559_v28 = vpop.f32.mrf.mxu1 }
  0xe7   :  { %v194_v30 = vadd.f32 %v551_v27, %v51_v20  ;;  %v226_v35 = vadd.f32 %v559_v28, %v51_v20 }
  0xe8   :  { %v185_v31 = vpop.f32.mrf.mxu0  ;;  %v217_v32 = vpop.f32.mrf.mxu1 }
  0xe9   :  { %254 = vadd.xlane.f32.xlu1 %v194_v30  ;;  %248 = vadd.xlane.f32.xlu0 %v183_v29  ;;  %v705_v38 = vadd.f32 %v185_v31, %v51_v20  ;;  %v218_v39 = vadd.f32 %v217_v32, %v51_v20 }
  0xea   :  { %v554_v33 = vpop.f32.mrf.mxu0  ;;  %v562_v37 = vpop.f32.mrf.mxu1 }
  0xeb   :  { %v707_v42 = vadd.f32 %v554_v33, %v51_v20  ;;  %v726_v51 = vadd.f32 %v562_v37, %v51_v20 }
  0xec   :  { %v198_v36 = vpop.f32.mrf.mxu0  ;;  %v230_v41 = vpop.f32.mrf.mxu1 }
  0xed   :  { %270 = vadd.xlane.f32.xlu1 %v226_v35  ;;  %264 = vadd.xlane.f32.xlu0 %v215_v34  ;;  %v714_v46 = vadd.f32 %v198_v36, %v51_v20  ;;  %v720_v49 = vadd.f32 %v230_v41, %v51_v20 }
  0xee   :  { %v555_v40 = vpop.f32.mrf.mxu0  ;;  %v563_v45 = vpop.f32.mrf.mxu1 }
  0xef   :  { %v709_v43 = vadd.f32 %v555_v40, %v51_v20  ;;  %v728_v52 = vadd.f32 %v563_v45, %v51_v20 }
  0xf0   :  { %v201_v44 = vpop.f32.mrf.mxu0  ;;  %v233_v48 = vpop.f32.mrf.mxu1 }
  0xf1   :  { %266 = vadd.xlane.f32.xlu1 %v218_v39  ;;  %250 = vadd.xlane.f32.xlu0 %v705_v38  ;;  %v716_v47 = vadd.f32 %v201_v44, %v51_v20  ;;  %v722_v50 = vadd.f32 %v233_v48, %v51_v20 }
  0xf5   :  { %262 = vadd.xlane.f32.xlu1 %v709_v43  ;;  %260 = vadd.xlane.f32.xlu0 %v707_v42 }
  0xf9   :  { %258 = vadd.xlane.f32.xlu1 %v716_v47  ;;  %256 = vadd.xlane.f32.xlu0 %v714_v46 }
  0xfd   :  { %274 = vadd.xlane.f32.xlu1 %v722_v50  ;;  %272 = vadd.xlane.f32.xlu0 %v720_v49 }
 0x101   :  { %278 = vadd.xlane.f32.xlu1 %v728_v52  ;;  %276 = vadd.xlane.f32.xlu0 %v726_v51 }
 0x16e   :  { %v269_v54 = vpop.xlane.xlu0 %268  ;;  %v253_v55 = vpop.xlane.xlu1 %252 }
 0x16f   :  { %v290_v56 = vmul.f32 0.03125, %v269_v54  ;;  %v282_v57 = vmul.f32 0.03125, %v253_v55 }
 0x171   :  { %v735_v58 = vsub.f32 %v223_v24, %v290_v56  ;;  %v737_v59 = vsub.f32 %v191_v23, %v282_v57 }
 0x172   :  { %v255_v60 = vpop.xlane.xlu1 %254  ;;  %v249_v61 = vpop.xlane.xlu0 %248 }
 0x173   :  { %v283_v62 = vmul.f32 0.03125, %v255_v60  ;;  %v280_v63 = vmul.f32 0.03125, %v249_v61  ;;  %v314_v0 = vsel %vm247_vm0, %v737_v59, 0.0  ;;  %v322_v4 = vsel %vm247_vm0, %v735_v58, 0.0 }
 0x174   :  { %v330_v1 = vmul.f32 %v314_v0, %v314_v0  ;;  %v338_v11 = vmul.f32 %v322_v4, %v322_v4 }
 0x175   :  { %v742_v2 = vsub.f32 %v194_v30, %v283_v62  ;;  %v744_v3 = vsub.f32 %v183_v29, %v280_v63 }
 0x176   :  { %v271_v5 = vpop.xlane.xlu1 %270  ;;  %348 = vadd.xlane.f32.xlu0 %v330_v1  ;;  %v265_v6 = vpop.xlane.xlu0 %264 }
 0x177   :  { %v291_v7 = vmul.f32 0.03125, %v271_v5  ;;  %v288_v8 = vmul.f32 0.03125, %v265_v6  ;;  %v315_v9 = vsel %vm247_vm0, %v742_v2, 0.0  ;;  %v312_v14 = vsel %vm247_vm0, %v744_v3, 0.0 }
 0x178   :  { %v331_v10 = vmul.f32 %v315_v9, %v315_v9  ;;  %v328_v23 = vmul.f32 %v312_v14, %v312_v14 }
 0x179   :  { %v752_v12 = vsub.f32 %v226_v35, %v291_v7  ;;  %v754_v13 = vsub.f32 %v215_v34, %v288_v8 }
 0x17a   :  { %v267_v15 = vpop.xlane.xlu1 %266  ;;  %350 = vadd.xlane.f32.xlu1 %v331_v10  ;;  %364 = vadd.xlane.f32.xlu0 %v338_v11  ;;  %v251_v16 = vpop.xlane.xlu0 %250 }
 0x17b   :  { %v289_v18 = vmul.f32 0.03125, %v267_v15  ;;  %v281_v20 = vmul.f32 0.03125, %v251_v16  ;;  %v323_v21 = vsel %vm247_vm0, %v752_v12, 0.0  ;;  %v320_v26 = vsel %vm247_vm0, %v754_v13, 0.0 }
 0x17c   :  { %v339_v22 = vmul.f32 %v323_v21, %v323_v21  ;;  %v336_v32 = vmul.f32 %v320_v26, %v320_v26 }
 0x17d   :  { %v762_v24 = vsub.f32 %v218_v39, %v289_v18  ;;  %v765_v25 = vsub.f32 %v705_v38, %v281_v20 }
 0x17e   :  { %v263_v27 = vpop.xlane.xlu1 %262  ;;  %366 = vadd.xlane.f32.xlu1 %v339_v22  ;;  %344 = vadd.xlane.f32.xlu0 %v328_v23  ;;  %v261_v28 = vpop.xlane.xlu0 %260 }
 0x17f   :  { %v287_v29 = vmul.f32 0.03125, %v263_v27  ;;  %v286_v30 = vmul.f32 0.03125, %v261_v28  ;;  %v313_v31 = vsel %vm247_vm0, %v765_v25, 0.0  ;;  %v321_v36 = vsel %vm247_vm0, %v762_v24, 0.0 }
 0x180   :  { %v329_v33 = vmul.f32 %v313_v31, %v313_v31  ;;  %v337_v44 = vmul.f32 %v321_v36, %v321_v36 }
 0x181   :  { %v774_v34 = vsub.f32 %v709_v43, %v287_v29  ;;  %v777_v35 = vsub.f32 %v707_v42, %v286_v30 }
 0x182   :  { %v259_v37 = vpop.xlane.xlu1 %258  ;;  %360 = vadd.xlane.f32.xlu0 %v336_v32  ;;  %346 = vadd.xlane.f32.xlu1 %v329_v33  ;;  %v257_v38 = vpop.xlane.xlu0 %256 }
 0x183   :  { %v285_v39 = vmul.f32 0.03125, %v259_v37  ;;  %v284_v40 = vmul.f32 0.03125, %v257_v38  ;;  %v318_v41 = vsel %vm247_vm0, %v777_v35, 0.0  ;;  %v319_v48 = vsel %vm247_vm0, %v774_v34, 0.0 }
 0x184   :  { %v334_v43 = vmul.f32 %v318_v41, %v318_v41  ;;  %v335_v61 = vmul.f32 %v319_v48, %v319_v48  ;;  %v442_v37 = vsub.s32 1, %v696_v17 }
 0x185   :  { %v786_v45 = vsub.f32 %v716_v47, %v285_v39  ;;  %v789_v42 = vsub.f32 %v714_v46, %v284_v40  ;;  %v462_v40 = vsub.s32 2, %v696_v17 }
 0x186   :  { %v275_v54 = vpop.xlane.xlu1 %274  ;;  %362 = vadd.xlane.f32.xlu1 %v337_v44  ;;  %356 = vadd.xlane.f32.xlu0 %v334_v43  ;;  %v273_v55 = vpop.xlane.xlu0 %272 }
 0x187   :  { %v293_v56 = vmul.f32 0.03125, %v275_v54  ;;  %v292_v57 = vmul.f32 0.03125, %v273_v55  ;;  %v316_v60 = vsel %vm247_vm0, %v789_v42, 0.0  ;;  %v317_v63 = vsel %vm247_vm0, %v786_v45, 0.0 }
 0x188   :  { %v332_v47 = vmul.f32 %v316_v60, %v316_v60  ;;  %v333_v7 = vmul.f32 %v317_v63, %v317_v63  ;;  %v827_v54 = vrot.slane %v702_v19, %v442_v37  ;;  %v830_v60 = vrot.slane %v702_v19, %v462_v40 }
 0x189   :  { %v798_v62 = vsub.f32 %v722_v50, %v293_v56  ;;  %v801_v46 = vsub.f32 %v720_v49, %v292_v57 }
 0x18a   :  { %v279_v0 = vpop.xlane.xlu1 %278  ;;  %358 = vadd.xlane.f32.xlu1 %v335_v61  ;;  %352 = vadd.xlane.f32.xlu0 %v332_v47  ;;  %v277_v1 = vpop.xlane.xlu0 %276 }
 0x18b   :  { %v295_v4 = vmul.f32 0.03125, %v279_v0  ;;  %v294_v5 = vmul.f32 0.03125, %v277_v1  ;;  %v324_v6 = vsel %vm247_vm0, %v801_v46, 0.0  ;;  %v325_v9 = vsel %vm247_vm0, %v798_v62, 0.0 }
 0x18c   :  { %v340_v50 = vmul.f32 %v324_v6, %v324_v6  ;;  %v341_v11 = vmul.f32 %v325_v9, %v325_v9 }
 0x18d   :  { %v810_v8 = vsub.f32 %v728_v52, %v295_v4  ;;  %v813_v49 = vsub.f32 %v726_v51, %v294_v5 }
 0x18e   :  { %354 = vadd.xlane.f32.xlu1 %v333_v7  ;;  %368 = vadd.xlane.f32.xlu0 %v340_v50 }
 0x18f   :  { %v326_v10 = vsel %vm247_vm0, %v813_v49, 0.0  ;;  %v327_v52 = vsel %vm247_vm0, %v810_v8, 0.0 }
 0x190   :  { %v342_v14 = vmul.f32 %v326_v10, %v326_v10  ;;  %v343_v51 = vmul.f32 %v327_v52, %v327_v52 }
 0x192   :  { %370 = vadd.xlane.f32.xlu1 %v341_v11  ;;  %372 = vadd.xlane.f32.xlu0 %v342_v14 }
 0x196   :  { %374 = vadd.xlane.f32.xlu1 %v343_v51 }
 0x1ff   :  { %v349_v15 = vpop.xlane.xlu0 %348 }
 0x200   :  { %v378_v16 = vmul.f32 0.03125, %v349_v15 }
 0x202   :  { %v394_v18 = vadd.f32 1e-05, %v378_v16 }
 0x203   :  { %v351_v20 = vpop.xlane.xlu1 %350  ;;  %v365_v21 = vpop.xlane.xlu0 %364 }
 0x204   :  { %596 = vrsqrt.f32 %v394_v18  ;;  %v379_v22 = vmul.f32 0.03125, %v351_v20  ;;  %v386_v23 = vmul.f32 0.03125, %v365_v21 }
 0x206   :  { %v395_v26 = vadd.f32 1e-05, %v379_v22  ;;  %v402_v27 = vadd.f32 1e-05, %v386_v23 }
 0x207   :  { %v367_v28 = vpop.xlane.xlu1 %366  ;;  %v345_v29 = vpop.xlane.xlu0 %344 }
 0x208   :  { %598 = vrsqrt.f32 %v395_v26  ;;  %v387_v30 = vmul.f32 0.03125, %v367_v28  ;;  %v376_v53 = vmul.f32 0.03125, %v345_v29 }
 0x209   :  { %600 = vrsqrt.f32 %v402_v27 }
 0x20a   :  { %v403_v31 = vadd.f32 1e-05, %v387_v30  ;;  %v392_v32 = vadd.f32 1e-05, %v376_v53 }
 0x20b   :  { %v347_v33 = vpop.xlane.xlu1 %346  ;;  %v361_v36 = vpop.xlane.xlu0 %360 }
 0x20c   :  { %602 = vrsqrt.f32 %v403_v31  ;;  %v377_v38 = vmul.f32 0.03125, %v347_v33  ;;  %v384_v39 = vmul.f32 0.03125, %v361_v36 }
 0x20d   :  { %604 = vrsqrt.f32 %v392_v32 }
 0x20e   :  { %v393_v41 = vadd.f32 1e-05, %v377_v38  ;;  %v400_v44 = vadd.f32 1e-05, %v384_v39 }
 0x20f   :  { %v363_v43 = vpop.xlane.xlu1 %362  ;;  %v357_v48 = vpop.xlane.xlu0 %356 }
 0x210   :  { %606 = vrsqrt.f32 %v393_v41  ;;  %v385_v55 = vmul.f32 0.03125, %v363_v43  ;;  %v382_v56 = vmul.f32 0.03125, %v357_v48 }
 0x211   :  { %v597_v57 = vpop.eup %596  ;;  %608 = vrsqrt.f32 %v400_v44 }
 0x212   :  { %v426_v61 = vmul.f32 %v597_v57, %v737_v59  ;;  %v401_v47 = vadd.f32 1e-05, %v385_v55  ;;  %v398_v63 = vadd.f32 1e-05, %v382_v56 }
 0x213   :  { %v359_v17 = vpop.xlane.xlu1 %358  ;;  %v353_v0 = vpop.xlane.xlu0 %352 }
 0x214   :  { %v446_v1 = vmul.f32 %v827_v54, %v426_v61  ;;  %610 = vrsqrt.f32 %v401_v47  ;;  %v383_v4 = vmul.f32 0.03125, %v359_v17  ;;  %v380_v5 = vmul.f32 0.03125, %v353_v0 }
 0x215   :  { %v599_v6 = vpop.eup %598  ;;  %612 = vrsqrt.f32 %v398_v63 }
 0x216   :  { %v601_v7 = vpop.eup %600  ;;  %v466_v50 = vadd.f32 %v830_v60, %v446_v1  ;;  %v427_v9 = vmul.f32 %v599_v6, %v742_v2  ;;  %v399_v19 = vadd.f32 1e-05, %v383_v4  ;;  %v396_v10 = vadd.f32 1e-05, %v380_v5 }
 0x217   :  { %v434_v59 = vmul.f32 %v601_v7, %v735_v58  ;;  %v355_v11 = vpop.xlane.xlu1 %354  ;;  %v369_v14 = vpop.xlane.xlu0 %368 }
 0x218   :  { %482 = vst [vmem:[%s931_s3 + $0x10] sm:$0xff] %v466_v50  ;;  %v447_v52 = vmul.f32 %v827_v54, %v427_v9  ;;  %614 = vrsqrt.f32 %v399_v19  ;;  %v381_v51 = vmul.f32 0.03125, %v355_v11  ;;  %v388_v15 = vmul.f32 0.03125, %v369_v14 }
 0x219   :  { %v603_v16 = vpop.eup %602  ;;  %v454_v18 = vmul.f32 %v827_v54, %v434_v59  ;;  %616 = vrsqrt.f32 %v396_v10 }
 0x21a   :  { %v605_v2 = vpop.eup %604  ;;  %v467_v20 = vadd.f32 %v830_v60, %v447_v52  ;;  %v435_v58 = vmul.f32 %v603_v16, %v752_v12  ;;  %v397_v21 = vadd.f32 1e-05, %v381_v51  ;;  %v404_v22 = vadd.f32 1e-05, %v388_v15 }
 0x21b   :  { %v474_v23 = vadd.f32 %v830_v60, %v454_v18  ;;  %v424_v26 = vmul.f32 %v605_v2, %v744_v3  ;;  %v371_v27 = vpop.xlane.xlu1 %370  ;;  %v373_v28 = vpop.xlane.xlu0 %372 }
 0x21c   :  { %483 = vst [vmem:[%s931_s3 + $0x18] sm:$0xff] %v467_v20  ;;  %v455_v29 = vmul.f32 %v827_v54, %v435_v58  ;;  %618 = vrsqrt.f32 %v397_v21  ;;  %v389_v30 = vmul.f32 0.03125, %v371_v27  ;;  %v390_v53 = vmul.f32 0.03125, %v373_v28 }
 0x21d   :  { %v607_v31 = vpop.eup %606  ;;  %490 = vst [vmem:[%s931_s3 + $0x50] sm:$0xff] %v474_v23  ;;  %v444_v12 = vmul.f32 %v827_v54, %v424_v26  ;;  %620 = vrsqrt.f32 %v404_v22 }
 0x21e   :  { %v609_v3 = vpop.eup %608  ;;  %v475_v32 = vadd.f32 %v830_v60, %v455_v29  ;;  %v425_v33 = vmul.f32 %v607_v31, %v765_v25  ;;  %v405_v36 = vadd.f32 1e-05, %v389_v30  ;;  %v406_v37 = vadd.f32 1e-05, %v390_v53 }
 0x21f   :  { %v464_v38 = vadd.f32 %v830_v60, %v444_v12  ;;  %v432_v39 = vmul.f32 %v609_v3, %v754_v13  ;;  %v375_v40 = vpop.xlane.xlu1 %374 }
 0x220   :  { %491 = vst [vmem:[%s931_s3 + $0x58] sm:$0xff] %v475_v32  ;;  %v445_v41 = vmul.f32 %v827_v54, %v425_v33  ;;  %622 = vrsqrt.f32 %v405_v36  ;;  %v391_v44 = vmul.f32 0.03125, %v375_v40 }
 0x221   :  { %v611_v43 = vpop.eup %610  ;;  %480 = vst [vmem:[%s931_s3] sm:$0xff] %v464_v38  ;;  %v452_v25 = vmul.f32 %v827_v54, %v432_v39  ;;  %624 = vrsqrt.f32 %v406_v37 }
 0x222   :  { %v613_v48 = vpop.eup %612  ;;  %v465_v13 = vadd.f32 %v830_v60, %v445_v41  ;;  %v433_v55 = vmul.f32 %v611_v43, %v762_v24  ;;  %v407_v56 = vadd.f32 1e-05, %v391_v44 }
 0x223   :  { %v472_v57 = vadd.f32 %v830_v60, %v452_v25  ;;  %v430_v61 = vmul.f32 %v613_v48, %v777_v35 }
 0x224   :  { %481 = vst [vmem:[%s931_s3 + $0x8] sm:$0xff] %v465_v13  ;;  %v453_v47 = vmul.f32 %v827_v54, %v433_v55  ;;  %626 = vrsqrt.f32 %v407_v56 }
 0x225   :  { %v615_v63 = vpop.eup %614  ;;  %488 = vst [vmem:[%s931_s3 + $0x40] sm:$0xff] %v472_v57  ;;  %v450_v17 = vmul.f32 %v827_v54, %v430_v61 }
 0x226   :  { %v617_v24 = vpop.eup %616  ;;  %v473_v0 = vadd.f32 %v830_v60, %v453_v47  ;;  %v431_v1 = vmul.f32 %v615_v63, %v774_v34 }
 0x227   :  { %v470_v35 = vadd.f32 %v830_v60, %v450_v17  ;;  %v428_v4 = vmul.f32 %v617_v24, %v789_v42 }
 0x228   :  { %489 = vst [vmem:[%s931_s3 + $0x48] sm:$0xff] %v473_v0  ;;  %v451_v5 = vmul.f32 %v827_v54, %v431_v1 }
 0x229   :  { %v619_v6 = vpop.eup %618  ;;  %486 = vst [vmem:[%s931_s3 + $0x30] sm:$0xff] %v470_v35  ;;  %v448_v7 = vmul.f32 %v827_v54, %v428_v4 }
 0x22a   :  { %v621_v50 = vpop.eup %620  ;;  %v471_v34 = vadd.f32 %v830_v60, %v451_v5  ;;  %v429_v9 = vmul.f32 %v619_v6, %v786_v45 }
 0x22b   :  { %v468_v42 = vadd.f32 %v830_v60, %v448_v7  ;;  %v436_v19 = vmul.f32 %v621_v50, %v801_v46 }
 0x22c   :  { %487 = vst [vmem:[%s931_s3 + $0x38] sm:$0xff] %v471_v34  ;;  %v449_v10 = vmul.f32 %v827_v54, %v429_v9 }
 0x22d   :  { %v623_v59 = vpop.eup %622  ;;  %484 = vst [vmem:[%s931_s3 + $0x20] sm:$0xff] %v468_v42  ;;  %v456_v11 = vmul.f32 %v827_v54, %v436_v19 }
 0x22e   :  { %v625_v14 = vpop.eup %624  ;;  %v469_v45 = vadd.f32 %v830_v60, %v449_v10  ;;  %v437_v52 = vmul.f32 %v623_v59, %v798_v62 }
 0x22f   :  { %v476_v46 = vadd.f32 %v830_v60, %v456_v11  ;;  %v438_v51 = vmul.f32 %v625_v14, %v813_v49 }
 0x230   :  { %485 = vst [vmem:[%s931_s3 + $0x28] sm:$0xff] %v469_v45  ;;  %v457_v15 = vmul.f32 %v827_v54, %v437_v52 }
 0x231   :  { %v627_v16 = vpop.eup %626  ;;  %492 = vst [vmem:[%s931_s3 + $0x60] sm:$0xff] %v476_v46  ;;  %v458_v18 = vmul.f32 %v827_v54, %v438_v51 }
 0x232   :  { %v477_v2 = vadd.f32 %v830_v60, %v457_v15  ;;  %v439_v62 = vmul.f32 %v627_v16, %v810_v8 }
 0x233   :  { %v478_v20 = vadd.f32 %v830_v60, %v458_v18 }
 0x234   :  { %493 = vst [vmem:[%s931_s3 + $0x68] sm:$0xff] %v477_v2  ;;  %v459_v49 = vmul.f32 %v827_v54, %v439_v62 }
 0x235   :  { %494 = vst [vmem:[%s931_s3 + $0x70] sm:$0xff] %v478_v20 }
 0x236   :  { %v479_v58 = vadd.f32 %v830_v60, %v459_v49 }
 0x238   :  { %495 = vst [vmem:[%s931_s3 + $0x78] sm:$0xff] %v479_v58 }

</bundles_post_ra>
